<compile_context>
chip_gen: v6e
topology: v6e:2x2x1
jax: 0.10.0
libtpu: 0.0.40
codegen_flags: <defaults>
</compile_context>

<pallas_src>
import numpy as np
import jax
import jax.numpy as jnp
from jax.experimental import pallas as pl
from jax.experimental.pallas import tpu as pltpu


def _make_gamma_kernel(gamma, bias):
    gamma = float(gamma)
    bias = float(bias)

    def kernel(x_ref, c_ref, o_ref):
        # x_ref: (TM, L) packed rows; c_ref: (L, L) block-diag cosine DFT
        # (edge-bin zeroing already folded into c_ref).
        xr = jnp.dot(x_ref[...], c_ref[...], preferred_element_type=jnp.float32)
        y = xr + bias
        pos = y > 0.0
        # PPower with a compile-time exponent (specialized common cases).
        if gamma == 1.0:
            powed = y
        elif gamma == 2.0:
            powed = y * y
        elif gamma == 0.5:
            powed = jnp.sqrt(jnp.where(pos, y, 1.0))
        else:
            powed = jnp.where(pos, y, 1.0) ** gamma
        o_ref[...] = jnp.where(pos, powed, 0.0).astype(o_ref.dtype)

    return kernel


def gamma_layer_forward(x, *, gamma=1.0, bias=0.0, filter_idx=1):
    """JAX/Pallas equivalent of gamma_layer.forward. x: (..., N) float32."""
    orig_shape = x.shape
    N = int(orig_shape[-1])
    M = int(np.prod(orig_shape[:-1]))

    # ---- lane-dense grouping: pack G consecutive length-N rows into one row
    # of width L = G*N so the lane axis is dense and the MXU sees native shapes.
    if 256 % N == 0:
        G = 256 // N          # 256-wide: native on v6e/v7x MXU
    elif 128 % N == 0:
        G = 128 // N          # 128-wide: native on v5e MXU
    else:
        G = 1                 # TODO(synk): N not dividing 128/256 stays narrow
    L = G * N

    # ---- row tiling for double-buffered pipelining.
    Mg_raw = -(-M // G)                         # grouped row count (ceil)
    TM_MAX = 1024                               # (1024, 256) f32 tile = 1 MiB
    if Mg_raw <= TM_MAX:
        TM = max(8, ((Mg_raw + 7) // 8) * 8)    # single tile, sublane-aligned
    else:
        TM = TM_MAX
    Mg = ((Mg_raw + TM - 1) // TM) * TM         # pad grouped rows to tile mult.
    M_pad = Mg * G

    x2 = x.reshape(M, N).astype(jnp.float32)
    if M_pad != M:
        x2 = jnp.pad(x2, ((0, M_pad - M), (0, 0)))
    xg = x2.reshape(Mg, L)                      # free: row-major contiguous

    # ---- block-diagonal cosine DFT matrix with edge-bin mask folded in.
    # Real part of torch.rfft(x, 1, normalized=True, onesided=False):
    #   X[k] = sum_n x[n] * cos(2*pi*n*k/N) / sqrt(N)
    n = np.arange(N)
    C = (np.cos(2.0 * np.pi * np.outer(n, n) / N) / np.sqrt(N)).astype(np.float32)
    if filter_idx > 0:
        C[:, :filter_idx] = 0.0
        C[:, N - filter_idx:] = 0.0
    Cb = jnp.asarray(np.kron(np.eye(G, dtype=np.float32), C))   # (L, L)

    special = float(gamma) in (1.0, 2.0, 0.5)
    cost = pl.CostEstimate(
        flops=2 * Mg * L * L,
        transcendentals=0 if special else 2 * Mg * L,
        bytes_accessed=(2 * Mg * L + L * L) * 4,
    )

    out = pl.pallas_call(
        _make_gamma_kernel(gamma, bias),
        out_shape=jax.ShapeDtypeStruct((Mg, L), jnp.float32),
        grid=(Mg // TM,),
        in_specs=[
            pl.BlockSpec((TM, L), lambda i: (i, 0)),   # row tiles, pipelined
            pl.BlockSpec((L, L), lambda i: (0, 0)),    # DFT matrix, resident
        ],
        out_specs=pl.BlockSpec((TM, L), lambda i: (i, 0)),
        compiler_params=pltpu.CompilerParams(
            dimension_semantics=("parallel",)),        # dual-TC sharding (v7x)
        cost_estimate=cost,
    )(xg, Cb)

    out = out.reshape(M_pad, N)[:M]
    return out.reshape(orig_shape)


if __name__ == "__main__":
    key = jax.random.PRNGKey(0)
    # NCHW-like input; FFT along the last axis (size 16)
    x = jax.random.normal(key, (2, 4, 16, 16), dtype=jnp.float32)

    # parameters matching the module defaults: gamma=1.0, bias=0.0, filter_idx=1
    out = gamma_layer_forward(x, gamma=1.0, bias=0.0, filter_idx=1)
    out = jax.block_until_ready(out)

    # pure-JAX reference
    N = x.shape[-1]
    ref = jnp.real(jnp.fft.fft(x, axis=-1)) / jnp.sqrt(N)
    ref = ref.at[..., :1].set(0.0)
    ref = ref.at[..., -1:].set(0.0)
    ref = ref + 0.0  # bias
    pos = ref > 0.0
    ref = jnp.where(pos, jnp.where(pos, ref, 1.0) ** 1.0, 0.0)

    assert np.allclose(np.asarray(out), np.asarray(ref), atol=1e-3), "mismatch vs reference"
    print("KERNEL_OK")
</pallas_src>

<mosaic_0001>
module attributes {stable_mosaic.version = 11 : i64} {
  func.func @kernel(%arg0: i32, %arg1: memref<8x256xf32, #tpu.memory_space<vmem>>, %arg2: memref<256x256xf32, #tpu.memory_space<vmem>>, %arg3: memref<8x256xf32, #tpu.memory_space<vmem>>) attributes {dimension_semantics = [#tpu.dimension_semantics<parallel>], iteration_bounds = array<i64: 1>, scalar_prefetch = 0 : i64, scratch_operands = 0 : i64, tpu.core_type = #tpu.core_type<tc>, window_params = [{transform_indices = @transform_0, window_bounds = array<i64: 8, 256>}, {pipeline_mode = #tpu.pipeline_mode<synchronous>, transform_indices = @transform_1, window_bounds = array<i64: 256, 256>}, {transform_indices = @transform_2, window_bounds = array<i64: 8, 256>}]} {
    %c0 = arith.constant 0 : index
    %c0_0 = arith.constant 0 : index
    %0 = vector.load %arg1[%c0, %c0_0] : memref<8x256xf32, #tpu.memory_space<vmem>>, vector<8x256xf32>
    %c0_1 = arith.constant 0 : index
    %c0_2 = arith.constant 0 : index
    %1 = vector.load %arg2[%c0_1, %c0_2] : memref<256x256xf32, #tpu.memory_space<vmem>>, vector<256x256xf32>
    %cst = arith.constant dense<0.000000e+00> : vector<8x256xf32>
    %2 = tpu.matmul %0, %1, %cst {dimension_numbers = #tpu.dot_dimension_numbers<[1], [0], [0], [1], [0, 0, 1, 1], [], []>} : vector<8x256xf32>, vector<256x256xf32>, vector<8x256xf32> -> vector<8x256xf32>
    %cst_3 = arith.constant 0.000000e+00 : f32
    %3 = vector.broadcast %cst_3 : f32 to vector<8x256xf32>
    %4 = arith.addf %2, %3 : vector<8x256xf32>
    %cst_4 = arith.constant 0.000000e+00 : f32
    %5 = vector.broadcast %cst_4 : f32 to vector<8x256xf32>
    %6 = arith.cmpf ogt, %4, %5 : vector<8x256xf32>
    %cst_5 = arith.constant 0.000000e+00 : f32
    %7 = vector.broadcast %cst_5 : f32 to vector<8x256xf32>
    %8 = arith.select %6, %4, %7 : vector<8x256xi1>, vector<8x256xf32>
    %c0_6 = arith.constant 0 : index
    %c0_7 = arith.constant 0 : index
    %9 = vector.load %arg3[%c0_6, %c0_7] : memref<8x256xf32, #tpu.memory_space<vmem>>, vector<8x256xf32>
    tpu.vector_store %arg3[%c0_6, %c0_7], %8 {strides = array<i32>} : memref<8x256xf32, #tpu.memory_space<vmem>>, vector<8x256xf32>,
    return
  }
  func.func @transform_0(%arg0: i32) -> (i32, i32) {
    %c0_i32 = arith.constant 0 : i32
    %c0_i32_0 = arith.constant 0 : i32
    return %arg0, %c0_i32 : i32, i32
  }
  func.func @transform_1(%arg0: i32) -> (i32, i32) {
    %c0_i32 = arith.constant 0 : i32
    %c0_i32_0 = arith.constant 0 : i32
    %c0_i32_1 = arith.constant 0 : i32
    return %c0_i32, %c0_i32_0 : i32, i32
  }
  func.func @transform_2(%arg0: i32) -> (i32, i32) {
    %c0_i32 = arith.constant 0 : i32
    %c0_i32_0 = arith.constant 0 : i32
    return %arg0, %c0_i32 : i32, i32
  }
}

</mosaic_0001>

<bundles_post_ra>
// kernel: tpu_custom_call.1
= control target key start
LH: loop header
LB: loop body
LE: loop exit
PB: predicated region body
PF: predicated region fallthrough
CT: control target
= control target key end

     0   :  { %7 = vsyncpa [#allocation3], 0  ;;  %s297_s0 = inlined_call_operand.hbm [shape: f32[8,256], index: 0, kind: input, shape index: {}]   ;;  %s298_s1 = inlined_call_operand.hbm [shape: f32[256,256], index: 1, kind: input, shape index: {}]   ;;  %s299_s2 = inlined_call_operand.hbm [shape: f32[8,256], index: 2, kind: output, shape index: {}]  }
   0x1   :  { %8 = vsyncpa [#allocation6], 0 }
   0x2   :  { %9 = vsyncpa [#allocation4], 0  ;;  %s268_s9 = smov [#allocation2]   ;;  %s269_s11 = smov [#allocation5]  }
   0x3   :  { %s16_s10 = sshll.u32 %s268_s9, 4  ;;  %s25_s12 = sshll.u32 %s269_s11, 4  ;;  %s17_s10 = int_to_ptr.vmem [resolvable:$true] %s16_s10  ;;  %s26_s12 = int_to_ptr.vmem [resolvable:$true] %s25_s12 }
   0x4   :  { %s210_s13 = scalar_lea.vmem %s17_s10, 256  ;;  %p215_p1 = scmp.lt.s32.totalorder %s17_s10, %s17_s10 }
   0x5   :  { %p211_p0 = scmp.ne.s32.totalorder %s17_s10, %s210_s13  ;;  %p216_p2 = scmp.lt.s32.totalorder %s210_s13, %s210_s13 }
   0x7   :  { %p217_p3 = por %p216_p2, %p215_p1 }
   0x9   :  { %p218_p4 = pnand %p217_p3, %p211_p0 }
   0xb   :  { %221 = shalt.err (!%p218_p4)
}
   0xc   :  { %19 = dma.hbm_to_vmem [thread:$0]  %s297_s0, 256, %s17_s10, [#allocation3]  }
   0xd   :  { %s230_s16 = scalar_lea.vmem %s26_s12, 8192  ;;  %p235_p6 = scmp.lt.s32.totalorder %s26_s12, %s26_s12 }
   0xe   :  { %p231_p5 = scmp.ne.s32.totalorder %s26_s12, %s230_s16  ;;  %p236_p7 = scmp.lt.s32.totalorder %s230_s16, %s230_s16 }
  0x10   :  { %p237_p8 = por %p236_p7, %p235_p6 }
  0x12   :  { %p238_p9 = pnand %p237_p8, %p231_p5 }
  0x14   :  { %241 = shalt.err (!%p238_p9)
}
  0x15   :  { %s270_s17 = smov 256   ;;  %s271_s18 = smov 16  }
  0x16   :  { %31 = dma.hbm_to_vmem [thread:$0]  %s298_s1, 8192, %s26_s12, [#allocation6], %s270_s17, %s270_s17, %s271_s18  }
  0x17   :  { %262 = dma.done.wait [#allocation3], 256  }
  0x18   :  { %263 = vsyncadd [#allocation3], 4294967040 }
  0x19   :  { %264 = dma.done.wait [#allocation6], 8192  }
  0x1a   :  { %265 = vsyncadd [#allocation6], 4294959104  ;;  %v71_v0 = vld [vmem:[#allocation5 + $0xf8] sm:$0xff]  ;;  %v70_v1 = vld [vmem:[#allocation5 + $0xf0] sm:$0xff]  ;;  %s272_s0 = smov [#allocation7]  }
  0x1b   :  { %v69_v2 = vld [vmem:[#allocation5 + $0xe8] sm:$0xff]  ;;  %104 = vmatprep.subr.mxu0 %v71_v0  ;;  %v68_v3 = vld [vmem:[#allocation5 + $0xe0] sm:$0xff]  ;;  %v67_v4 = vld [vmem:[#allocation5 + $0xd8] sm:$0xff]  ;;  %s187_s1 = sshll.u32 %s272_s0, 4  ;;  %s188_s1 = int_to_ptr.vmem [resolvable:$true] %s187_s1 }
  0x1c   :  { %105 = vmatpush1.msra.mxu0 %v70_v1  ;;  %v66_v5 = vld [vmem:[#allocation5 + $0xd0] sm:$0xff]  ;;  %v65_v6 = vld [vmem:[#allocation5 + $0xc8] sm:$0xff]  ;;  %v64_v7 = vld [vmem:[#allocation5 + $0xc0] sm:$0xff]  ;;  %s242_s21 = scalar_lea.vmem %s188_s1, 256  ;;  %p247_p11 = scmp.lt.s32.totalorder %s188_s1, %s188_s1 }
  0x1d   :  { %106 = vmatprep.subr.mxu0 %v69_v2  ;;  %v63_v8 = vld [vmem:[#allocation5 + $0xb8] sm:$0xff]  ;;  %v62_v9 = vld [vmem:[#allocation5 + $0xb0] sm:$0xff]  ;;  %v61_v10 = vld [vmem:[#allocation5 + $0xa8] sm:$0xff]  ;;  %p243_p10 = scmp.ne.s32.totalorder %s188_s1, %s242_s21  ;;  %p248_p12 = scmp.lt.s32.totalorder %s242_s21, %s242_s21 }
  0x1e   :  { %107 = vmatpush1.msra.mxu0 %v68_v3  ;;  %v60_v11 = vld [vmem:[#allocation5 + $0xa0] sm:$0xff]  ;;  %v59_v12 = vld [vmem:[#allocation5 + $0x98] sm:$0xff]  ;;  %v58_v13 = vld [vmem:[#allocation5 + $0x90] sm:$0xff] }
  0x1f   :  { %108 = vmatprep.subr.mxu0 %v67_v4  ;;  %v57_v14 = vld [vmem:[#allocation5 + $0x88] sm:$0xff]  ;;  %v56_v15 = vld [vmem:[#allocation5 + $0x80] sm:$0xff]  ;;  %v55_v16 = vld [vmem:[#allocation5 + $0x78] sm:$0xff]  ;;  %p249_p13 = por %p248_p12, %p247_p11 }
  0x20   :  { %109 = vmatpush1.msra.mxu0 %v66_v5  ;;  %v54_v17 = vld [vmem:[#allocation5 + $0x70] sm:$0xff]  ;;  %v53_v18 = vld [vmem:[#allocation5 + $0x68] sm:$0xff]  ;;  %v52_v19 = vld [vmem:[#allocation5 + $0x60] sm:$0xff] }
  0x21   :  { %110 = vmatprep.subr.mxu0 %v65_v6  ;;  %v51_v20 = vld [vmem:[#allocation5 + $0x58] sm:$0xff]  ;;  %v50_v21 = vld [vmem:[#allocation5 + $0x50] sm:$0xff]  ;;  %v49_v22 = vld [vmem:[#allocation5 + $0x48] sm:$0xff]  ;;  %p250_p0 = pnand %p249_p13, %p243_p10 }
  0x22   :  { %111 = vmatpush1.msra.mxu0 %v64_v7  ;;  %v48_v23 = vld [vmem:[#allocation5 + $0x40] sm:$0xff]  ;;  %v39_v24 = vld [vmem:[#allocation2 + $0x8] sm:$0xff]  ;;  %v46_v26 = vld [vmem:[#allocation5 + $0x30] sm:$0xff] }
  0x23   :  { %112 = vmatprep.subr.mxu0 %v63_v8  ;;  %v47_v25 = vld [vmem:[#allocation5 + $0x38] sm:$0xff]  ;;  %168 = vmatprep.mubr.f32.mxu0 %v39_v24  ;;  %v45_v27 = vld [vmem:[#allocation5 + $0x28] sm:$0xff]  ;;  %v44_v28 = vld [vmem:[#allocation5 + $0x20] sm:$0xff] }
  0x24   :  { %113 = vmatpush1.msra.mxu0 %v62_v9  ;;  %v43_v29 = vld [vmem:[#allocation5 + $0x18] sm:$0xff]  ;;  %v42_v30 = vld [vmem:[#allocation5 + $0x10] sm:$0xff]  ;;  %v41_v31 = vld [vmem:[#allocation5 + $0x8] sm:$0xff] }
  0x25   :  { %114 = vmatprep.subr.mxu0 %v61_v10  ;;  %v40_v32 = vld [vmem:[#allocation5] sm:$0xff]  ;;  %v103_v33 = vld [vmem:[#allocation5 + $0x1f8] sm:$0xff]  ;;  %v102_v34 = vld [vmem:[#allocation5 + $0x1f0] sm:$0xff] }
  0x26   :  { %115 = vmatpush1.msra.mxu0 %v60_v11  ;;  %v101_v35 = vld [vmem:[#allocation5 + $0x1e8] sm:$0xff]  ;;  %v100_v36 = vld [vmem:[#allocation5 + $0x1e0] sm:$0xff]  ;;  %v99_v37 = vld [vmem:[#allocation5 + $0x1d8] sm:$0xff] }
  0x27   :  { %116 = vmatprep.subr.mxu0 %v59_v12  ;;  %v98_v38 = vld [vmem:[#allocation5 + $0x1d0] sm:$0xff]  ;;  %v97_v39 = vld [vmem:[#allocation5 + $0x1c8] sm:$0xff]  ;;  %v96_v40 = vld [vmem:[#allocation5 + $0x1c0] sm:$0xff] }
  0x28   :  { %117 = vmatpush1.msra.mxu0 %v58_v13  ;;  %v95_v41 = vld [vmem:[#allocation5 + $0x1b8] sm:$0xff]  ;;  %v94_v42 = vld [vmem:[#allocation5 + $0x1b0] sm:$0xff]  ;;  %v93_v43 = vld [vmem:[#allocation5 + $0x1a8] sm:$0xff] }
  0x29   :  { %118 = vmatprep.subr.mxu0 %v57_v14  ;;  %v92_v44 = vld [vmem:[#allocation5 + $0x1a0] sm:$0xff]  ;;  %v91_v45 = vld [vmem:[#allocation5 + $0x198] sm:$0xff]  ;;  %v90_v46 = vld [vmem:[#allocation5 + $0x190] sm:$0xff] }
  0x2a   :  { %119 = vmatpush1.msra.mxu0 %v56_v15  ;;  %v89_v47 = vld [vmem:[#allocation5 + $0x188] sm:$0xff]  ;;  %v88_v48 = vld [vmem:[#allocation5 + $0x180] sm:$0xff]  ;;  %v87_v49 = vld [vmem:[#allocation5 + $0x178] sm:$0xff] }
  0x2b   :  { %120 = vmatprep.subr.mxu0 %v55_v16  ;;  %v86_v50 = vld [vmem:[#allocation5 + $0x170] sm:$0xff]  ;;  %v85_v51 = vld [vmem:[#allocation5 + $0x168] sm:$0xff]  ;;  %v84_v52 = vld [vmem:[#allocation5 + $0x160] sm:$0xff] }
  0x2c   :  { %121 = vmatpush1.msra.mxu0 %v54_v17  ;;  %v83_v53 = vld [vmem:[#allocation5 + $0x158] sm:$0xff]  ;;  %v82_v54 = vld [vmem:[#allocation5 + $0x150] sm:$0xff]  ;;  %v81_v55 = vld [vmem:[#allocation5 + $0x148] sm:$0xff] }
  0x2d   :  { %122 = vmatprep.subr.mxu0 %v53_v18  ;;  %v80_v56 = vld [vmem:[#allocation5 + $0x140] sm:$0xff]  ;;  %v79_v57 = vld [vmem:[#allocation5 + $0x138] sm:$0xff]  ;;  %v78_v58 = vld [vmem:[#allocation5 + $0x130] sm:$0xff] }
  0x2e   :  { %123 = vmatpush1.msra.mxu0 %v52_v19  ;;  %v77_v59 = vld [vmem:[#allocation5 + $0x128] sm:$0xff]  ;;  %v76_v60 = vld [vmem:[#allocation5 + $0x120] sm:$0xff]  ;;  %v75_v61 = vld [vmem:[#allocation5 + $0x118] sm:$0xff] }
  0x2f   :  { %124 = vmatprep.subr.mxu0 %v51_v20  ;;  %v74_v62 = vld [vmem:[#allocation5 + $0x110] sm:$0xff]  ;;  %v73_v63 = vld [vmem:[#allocation5 + $0x108] sm:$0xff]  ;;  %v72_v0 = vld [vmem:[#allocation5 + $0x100] sm:$0xff] }
  0x30   :  { %125 = vmatpush1.msra.mxu0 %v50_v21  ;;  %v38_v1 = vld [vmem:[#allocation2] sm:$0xff] }
  0x31   :  { %126 = vmatprep.subr.mxu0 %v49_v22 }
  0x32   :  { %127 = vmatpush1.msra.mxu0 %v48_v23 }
  0x33   :  { %128 = vmatprep.subr.mxu0 %v47_v25 }
  0x34   :  { %129 = vmatpush1.msra.mxu0 %v46_v26 }
  0x35   :  { %130 = vmatprep.subr.mxu0 %v45_v27 }
  0x36   :  { %131 = vmatpush1.msra.mxu0 %v44_v28 }
  0x37   :  { %132 = vmatprep.subr.mxu0 %v43_v29 }
  0x38   :  { %133 = vmatpush1.msra.mxu0 %v42_v30 }
  0x39   :  { %134 = vmatprep.subr.mxu0 %v41_v31 }
  0x3a   :  { %135 = vmatpush1.msra.mxu0 %v40_v32 }
  0x3b   :  { %136 = vmatprep.subr.mxu0 %v103_v33 }
  0x3c   :  { %137 = vmatpush2.msra.mxu0 %v102_v34 }
  0x3d   :  { %138 = vmatprep.subr.mxu0 %v101_v35 }
  0x3e   :  { %139 = vmatpush2.msra.mxu0 %v100_v36 }
  0x3f   :  { %140 = vmatprep.subr.mxu0 %v99_v37 }
  0x40   :  { %141 = vmatpush2.msra.mxu0 %v98_v38 }
  0x41   :  { %142 = vmatprep.subr.mxu0 %v97_v39 }
  0x42   :  { %143 = vmatpush2.msra.mxu0 %v96_v40 }
  0x43   :  { %144 = vmatprep.subr.mxu0 %v95_v41 }
  0x44   :  { %145 = vmatpush2.msra.mxu0 %v94_v42 }
  0x45   :  { %146 = vmatprep.subr.mxu0 %v93_v43 }
  0x46   :  { %147 = vmatpush2.msra.mxu0 %v92_v44 }
  0x47   :  { %148 = vmatprep.subr.mxu0 %v91_v45 }
  0x48   :  { %149 = vmatpush2.msra.mxu0 %v90_v46 }
  0x49   :  { %150 = vmatprep.subr.mxu0 %v89_v47 }
  0x4a   :  { %151 = vmatpush2.msra.mxu0 %v88_v48 }
  0x4b   :  { %152 = vmatprep.subr.mxu0 %v87_v49 }
  0x4c   :  { %153 = vmatpush2.msra.mxu0 %v86_v50 }
  0x4d   :  { %154 = vmatprep.subr.mxu0 %v85_v51 }
  0x4e   :  { %155 = vmatpush2.msra.mxu0 %v84_v52 }
  0x4f   :  { %156 = vmatprep.subr.mxu0 %v83_v53 }
  0x50   :  { %157 = vmatpush2.msra.mxu0 %v82_v54 }
  0x51   :  { %158 = vmatprep.subr.mxu0 %v81_v55 }
  0x52   :  { %159 = vmatpush2.msra.mxu0 %v80_v56 }
  0x53   :  { %160 = vmatprep.subr.mxu0 %v79_v57 }
  0x54   :  { %161 = vmatpush2.msra.mxu0 %v78_v58 }
  0x55   :  { %162 = vmatprep.subr.mxu0 %v77_v59 }
  0x56   :  { %163 = vmatpush2.msra.mxu0 %v76_v60 }
  0x57   :  { %164 = vmatprep.subr.mxu0 %v75_v61 }
  0x58   :  { %165 = vmatpush2.msra.mxu0 %v74_v62 }
  0x59   :  { %166 = vmatprep.subr.mxu0 %v73_v63 }
  0x5a   :  { %167 = vmatpush2.msra.mxu0 %v72_v0 }
  0x5b   :  { %169 = vmatmul.mubr.f32.vlgmr.msra.gmra.mxu0 %v38_v1 }
 0x11b   :  { %v170_v2 = vpop.f32.mrf.mxu0 }
 0x11c   :  { %vm175_vm0 = vcmp.gt.f32.partialorder %v170_v2, 0.0 }
 0x11d   :  { %v177_v3 = vsel %vm175_vm0, %v170_v2, 0.0  ;;  %v172_v4 = vpop.f32.mrf.mxu0 }
 0x11e   :  { %179 = vst [vmem:[#allocation7] sm:$0xff] %v177_v3  ;;  %vm176_vm1 = vcmp.gt.f32.partialorder %v172_v4, 0.0 }
 0x11f   :  { %v178_v5 = vsel %vm176_vm1, %v172_v4, 0.0 }
 0x120   :  { %180 = vst [vmem:[#allocation7 + $0x8] sm:$0xff] %v178_v5 }
 0x121   :  { %253 = shalt.err (!%p250_p0)
}
 0x122   :  { %190 = dma.vmem_to_hbm [thread:$0]  %s188_s1, 256, %s299_s2, [#allocation4]  }
 0x123   :  { %266 = dma.done.wait [#allocation4], 256  }
 0x124   :  { %267 = vsyncadd [#allocation4], 4294967040 }
 0x125   :  { %194 = vsyncpa [#allocation3], 1 }
 0x126   :  { %195 = vsyncpa [#allocation6], 1 }
 0x127   :  { %196 = vsyncpa [#allocation4], 1 }

</bundles_post_ra>
